<compile_context>
chip_gen: v7x
topology: tpu7x:2x2x1
jax: 0.10.0
libtpu: 0.0.40
codegen_flags: <defaults>
</compile_context>

<pallas_src>
import functools

import jax
import jax.numpy as jnp
from jax import lax
from jax.experimental import pallas as pl
from jax.experimental.pallas import tpu as pltpu


# ----------------------------- Pallas kernels --------------------------------
def _epilogue(acc_f32, b, a, o_ref):
    # BN bias + PReLU, all in f32; cast only at the store (bf16 output).
    y = acc_f32 + b
    y = jnp.where(y > 0.0, y, y * a)
    o_ref[...] = y.astype(o_ref.dtype)


def _conv_bn_prelu_kernel(p_ref, w_ref, b_ref, a_ref, o_ref):
    # p_ref: (TM, Kg)  bf16 im2col patch tile (one group)
    # w_ref: (Kg, Cp)  bf16 conv weight, BN scale pre-folded
    # b_ref: (1, Cp)   f32 folded BN bias
    # a_ref: (1, Cp)   f32 PReLU per-channel slope
    # o_ref: (TM, Cp)  bf16 output tile
    acc = jnp.dot(p_ref[...], w_ref[...], preferred_element_type=jnp.float32)
    _epilogue(acc, b_ref[...], a_ref[...], o_ref)


def _conv_bn_prelu_kernel_ktiled(p_ref, w_ref, b_ref, a_ref, o_ref, acc_ref):
    # Same as above but with a K reduction grid axis and an f32 accumulator.
    k = pl.program_id(2)

    @pl.when(k == 0)
    def _():
        acc_ref[...] = jnp.zeros_like(acc_ref)

    acc_ref[...] += jnp.dot(p_ref[...], w_ref[...],
                            preferred_element_type=jnp.float32)

    @pl.when(k == pl.num_programs(2) - 1)
    def _():
        _epilogue(acc_ref[...], b_ref[...], a_ref[...], o_ref)


# ------------------------------ tile planning ---------------------------------
def _round_up(x, m):
    return ((x + m - 1) // m) * m


def _vmem_cap_bytes():
    try:
        return int(pltpu.get_tpu_info().vmem_capacity_bytes)
    except Exception:
        return 64 * 1024 * 1024  # conservative (v7x per-TC physical)


def _plan(M, Kg, cout_g, G):
    """Pick (tm, tk, Kg_pad, Cp, vmem_limit_bytes) from the real VMEM footprint."""
    Cp = _round_up(cout_g, 128)

    K_TILE = 1024
    tk = Kg if Kg <= K_TILE else K_TILE
    Kg_pad = _round_up(Kg, tk)
    n_k = Kg_pad // tk

    cap = _vmem_cap_bytes()
    # Streaming budget: generous on v5e/v6e (128 MiB phys), tighter on v7x (64 MiB).
    budget = max(12 << 20, min(cap // 2, 40 << 20))

    # Footprint bookkeeping (bytes):
    #   fixed  : weight double-buffered bf16 + bias/alpha double-buffered f32
    #   per_row: patches (db bf16) + output (db bf16) + f32 accumulator (K-tiled)
    fixed = 2 * tk * Cp * 2 + 2 * 2 * Cp * 4
    per_row = 2 * tk * 2 + 2 * Cp * 2 + (Cp * 4 if n_k > 1 else 0)

    M_pad128 = _round_up(M, 128)
    tm = max((budget - fixed) // per_row, 1)
    tm = max(128, min(1024, (tm // 128) * 128))
    tm = min(tm, M_pad128)
    # Keep >= 2 M tiles when there is a single group so both v7x TensorCores
    # (which shard the "parallel" grid axes) have work.
    if G == 1 and M_pad128 >= 256:
        tm = min(tm, _round_up(M_pad128 // 2, 128))

    footprint = fixed + tm * per_row
    vmem_limit = int(min(max(footprint + (16 << 20), 32 << 20), int(cap * 0.9)))
    return tm, tk, Kg_pad, Cp, vmem_limit


# ------------------------------ pallas_call glue -------------------------------
def _grouped_conv_bn_prelu(patches_g, w_g, b_g, a_g, *, tm, tk, vmem_limit):
    """patches_g: (G, M_pad, Kg_pad) bf16; w_g: (G, Kg_pad, Cp) bf16;
    b_g, a_g: (G, 1, Cp) f32  ->  (G, M_pad, Cp) bf16."""
    G, M_pad, Kg_pad = patches_g.shape
    Cp = w_g.shape[-1]
    n_k = Kg_pad // tk
    out_shape = jax.ShapeDtypeStruct((G, M_pad, Cp), jnp.bfloat16)

    if n_k == 1:
        grid = (G, M_pad // tm)
        in_specs = [
            pl.BlockSpec((None, tm, tk), lambda g, i: (g, i, 0)),
            pl.BlockSpec((None, tk, Cp), lambda g, i: (g, 0, 0)),
            pl.BlockSpec((None, 1, Cp), lambda g, i: (g, 0, 0)),
            pl.BlockSpec((None, 1, Cp), lambda g, i: (g, 0, 0)),
        ]
        out_specs = pl.BlockSpec((None, tm, Cp), lambda g, i: (g, i, 0))
        kernel = _conv_bn_prelu_kernel
        scratch = []
        semantics = ("parallel", "parallel")
    else:
        grid = (G, M_pad // tm, n_k)
        in_specs = [
            pl.BlockSpec((None, tm, tk), lambda g, i, k: (g, i, k)),
            pl.BlockSpec((None, tk, Cp), lambda g, i, k: (g, k, 0)),
            pl.BlockSpec((None, 1, Cp), lambda g, i, k: (g, 0, 0)),
            pl.BlockSpec((None, 1, Cp), lambda g, i, k: (g, 0, 0)),
        ]
        out_specs = pl.BlockSpec((None, tm, Cp), lambda g, i, k: (g, i, 0))
        kernel = _conv_bn_prelu_kernel_ktiled
        scratch = [pltpu.VMEM((tm, Cp), jnp.float32)]
        semantics = ("parallel", "parallel", "arbitrary")

    return pl.pallas_call(
        kernel,
        out_shape=out_shape,
        grid_spec=pltpu.PrefetchScalarGridSpec(
            num_scalar_prefetch=0,
            grid=grid,
            in_specs=in_specs,
            out_specs=out_specs,
            scratch_shapes=scratch),
        compiler_params=pltpu.CompilerParams(
            dimension_semantics=semantics,
            vmem_limit_bytes=vmem_limit),
    )(patches_g, w_g, b_g, a_g)


# ---------------------------------- im2col ------------------------------------
def _im2col_nhwc(x_nhwc, kh, kw, sh, sw, ph, pw, Ho, Wo):
    """(N, H, W, C) -> (N*Ho*Wo, C*kh*kw). K ordered channel-major / tap-minor
    to match PyTorch weight.reshape(C_out, C_in//g * kh * kw)."""
    N, H, W, C = x_nhwc.shape
    if kh == 1 and kw == 1:
        # 1x1: "im2col" is just a reshape (plus pad/stride slice if requested).
        if ph or pw:
            x_nhwc = jnp.pad(x_nhwc, ((0, 0), (ph, ph), (pw, pw), (0, 0)))
        if sh != 1 or sw != 1 or ph or pw:
            x_nhwc = x_nhwc[:, 0:sh * Ho:sh, 0:sw * Wo:sw, :]
        return x_nhwc.reshape(N * Ho * Wo, C)
    # TODO(synk): gather the kh*kw taps inside the kernel (shifted NHWC windows
    #             via manual DMA) instead of materializing this in HBM.
    xp = jnp.pad(x_nhwc, ((0, 0), (ph, ph), (pw, pw), (0, 0)))
    taps = []
    for i in range(kh):
        for j in range(kw):
            taps.append(xp[:, i:i + sh * Ho:sh, j:j + sw * Wo:sw, :])  # (N,Ho,Wo,C)
    patches = jnp.stack(taps, axis=4)                 # (N, Ho, Wo, C, kh*kw)
    return patches.reshape(N * Ho * Wo, C * kh * kw)


# ------------------------------ public forward ---------------------------------
@functools.partial(
    jax.jit,
    static_argnames=("kernel", "stride", "padding", "groups", "eps",
                     "input_format", "output_format", "out_dtype"))
def conv_block_forward(x, conv_w, bn_gamma, bn_beta, bn_mean, bn_var, prelu_w,
                       *, kernel=(1, 1), stride=(1, 1), padding=(0, 0),
                       groups=1, eps=1e-5, input_format="NCHW",
                       output_format=None, out_dtype=jnp.float32):
    """Conv_block forward: Conv2d(bias=False, groups) + BatchNorm2d (eval) + PReLU.

    x:       (N, C_in, H, W) if input_format == "NCHW" else (N, H, W, C_in)
    conv_w:  (C_out, C_in//groups, kh, kw)   (PyTorch OIHW)
    bn_*:    (C_out,)
    prelu_w: (C_out,)
    returns  NCHW or NHWC (output_format, defaults to input_format), out_dtype.
    """
    if output_format is None:
        output_format = input_format
    kh, kw = kernel
    sh, sw = stride
    ph, pw = padding

    if input_format == "NCHW":
        N, C_in, H, W = x.shape
        x_nhwc = jnp.transpose(x, (0, 2, 3, 1))
    else:
        N, H, W, C_in = x.shape
        x_nhwc = x

    C_out = conv_w.shape[0]
    G = groups
    cin_g = C_in // G
    cout_g = C_out // G
    Kg = cin_g * kh * kw
    Ho = (H + 2 * ph - kh) // sh + 1
    Wo = (W + 2 * pw - kw) // sw + 1
    M = N * Ho * Wo

    tm, tk, Kg_pad, Cp, vmem_limit = _plan(M, Kg, cout_g, G)

    # Fold inference-mode BatchNorm: scale into the conv weight, bias into the
    # f32 kernel epilogue.
    scale = bn_gamma / jnp.sqrt(bn_var + eps)                    # (C_out,)
    bias = bn_beta - bn_mean * scale                             # (C_out,)

    w_g = conv_w.reshape(G, cout_g, Kg).transpose(0, 2, 1)       # (G, Kg, cout_g)
    w_g = w_g * scale.reshape(G, 1, cout_g)
    b_g = bias.reshape(G, 1, cout_g).astype(jnp.float32)
    a_g = prelu_w.reshape(G, 1, cout_g).astype(jnp.float32)

    # Lane-dense per-group output channels.
    if Cp != cout_g:
        pc = Cp - cout_g
        w_g = jnp.pad(w_g, ((0, 0), (0, 0), (0, pc)))
        b_g = jnp.pad(b_g, ((0, 0), (0, 0), (0, pc)))
        a_g = jnp.pad(a_g, ((0, 0), (0, 0), (0, pc)))

    # Patches in bf16 (halves the activation HBM traffic into the kernel).
    patches = _im2col_nhwc(x_nhwc.astype(jnp.bfloat16), kh, kw, sh, sw, ph, pw, Ho, Wo)
    if G > 1:
        patches_g = patches.reshape(M, G, Kg).transpose(1, 0, 2)  # (G, M, Kg)
    else:
        patches_g = patches.reshape(1, M, Kg)

    # Pad K for the K-tiled path (zeros contribute nothing to the matmul).
    if Kg_pad != Kg:
        w_g = jnp.pad(w_g, ((0, 0), (0, Kg_pad - Kg), (0, 0)))
        patches_g = jnp.pad(patches_g, ((0, 0), (0, 0), (0, Kg_pad - Kg)))
    w_g = w_g.astype(jnp.bfloat16)

    M_pad = _round_up(M, tm)
    if M_pad != M:
        patches_g = jnp.pad(patches_g, ((0, 0), (0, M_pad - M), (0, 0)))

    out = _grouped_conv_bn_prelu(patches_g, w_g, b_g, a_g,
                                 tm=tm, tk=tk, vmem_limit=vmem_limit)
    out = out[:, :M, :cout_g]                                     # (G, M, cout_g) bf16
    if G > 1:
        out = out.transpose(1, 0, 2).reshape(M, C_out)            # groups-major channels
    else:
        out = out.reshape(M, C_out)
    out = out.reshape(N, Ho, Wo, C_out)
    if output_format == "NCHW":
        out = out.transpose(0, 3, 1, 2)
    return out.astype(out_dtype)


# ------------------------------ reference -------------------------------------
def _reference(x, conv_w, bn_gamma, bn_beta, bn_mean, bn_var, prelu_w,
               *, stride, padding, groups, eps=1e-5):
    y = lax.conv_general_dilated(
        x, conv_w, window_strides=stride,
        padding=[(padding[0], padding[0]), (padding[1], padding[1])],
        dimension_numbers=("NCHW", "OIHW", "NCHW"),
        feature_group_count=groups)
    s = (bn_gamma / jnp.sqrt(bn_var + eps)).reshape(1, -1, 1, 1)
    b = (bn_beta - bn_mean * bn_gamma / jnp.sqrt(bn_var + eps)).reshape(1, -1, 1, 1)
    y = y * s + b
    a = prelu_w.reshape(1, -1, 1, 1)
    return jnp.where(y > 0, y, a * y)


# --------------------------------- main ----------------------------------------
def _run_case(key, *, N, C_in, H, W, C_out, kernel, stride, padding, groups):
    k_x, k_w, k_g, k_b, k_m, k_v, k_a = jax.random.split(key, 7)
    x = jax.random.normal(k_x, (N, C_in, H, W), jnp.float32)
    conv_w = jax.random.normal(k_w, (C_out, C_in // groups, *kernel), jnp.float32) * 0.1
    bn_gamma = jax.random.uniform(k_g, (C_out,), jnp.float32, 0.5, 1.5)
    bn_beta = jax.random.normal(k_b, (C_out,), jnp.float32) * 0.1
    bn_mean = jax.random.normal(k_m, (C_out,), jnp.float32) * 0.1
    bn_var = jax.random.uniform(k_v, (C_out,), jnp.float32, 0.5, 1.5)
    prelu_w = jax.random.uniform(k_a, (C_out,), jnp.float32, 0.1, 0.4)

    out = conv_block_forward(x, conv_w, bn_gamma, bn_beta, bn_mean, bn_var, prelu_w,
                             kernel=kernel, stride=stride, padding=padding,
                             groups=groups)
    out = jax.block_until_ready(out)

    ref = _reference(x, conv_w, bn_gamma, bn_beta, bn_mean, bn_var, prelu_w,
                     stride=stride, padding=padding, groups=groups)
    assert out.shape == ref.shape, (out.shape, ref.shape)
    # bf16 MXU inputs + bf16 kernel output -> looser tolerance vs f32 reference.
    assert jnp.allclose(out, ref, rtol=2e-2, atol=2e-2), "mismatch vs reference"


if __name__ == "__main__":
    key = jax.random.PRNGKey(0)
    k1, k2 = jax.random.split(key)

    # Case 1: Conv_block defaults — 1x1, stride 1, no padding, groups=1.
    _run_case(k1, N=2, C_in=4, H=16, W=16, C_out=8,
              kernel=(1, 1), stride=(1, 1), padding=(0, 0), groups=1)

    # Case 2: 3x3 grouped, strided, padded (exercises im2col + grouped path).
    _run_case(k2, N=2, C_in=8, H=12, W=12, C_out=16,
              kernel=(3, 3), stride=(2, 2), padding=(1, 1), groups=2)

    print("KERNEL_OK")
</pallas_src>

<mosaic_0001>
module attributes {stable_mosaic.version = 11 : i64} {
  func.func @_conv_bn_prelu_kernel(%arg0: i32, %arg1: i32, %arg2: memref<1x256x4xbf16, #tpu.memory_space<vmem>>, %arg3: memref<1x4x128xbf16, #tpu.memory_space<vmem>>, %arg4: memref<1x1x128xf32, #tpu.memory_space<vmem>>, %arg5: memref<1x1x128xf32, #tpu.memory_space<vmem>>, %arg6: memref<1x256x128xbf16, #tpu.memory_space<vmem>>) attributes {dimension_semantics = [#tpu.dimension_semantics<parallel>, #tpu.dimension_semantics<parallel>], iteration_bounds = array<i64: 1, 2>, scalar_prefetch = 0 : i64, scratch_operands = 0 : i64, tpu.core_type = #tpu.core_type<tc>, window_params = [{transform_indices = @transform_0, window_bounds = array<i64: 1, 256, 4>}, {transform_indices = @transform_1, window_bounds = array<i64: 1, 4, 128>}, {transform_indices = @transform_2, window_bounds = array<i64: 1, 1, 128>}, {transform_indices = @transform_3, window_bounds = array<i64: 1, 1, 128>}, {transform_indices = @transform_4, window_bounds = array<i64: 1, 256, 128>}]} {
    %c0 = arith.constant 0 : index
    %c0_0 = arith.constant 0 : index
    %c0_1 = arith.constant 0 : index
    %0 = vector.load %arg2[%c0, %c0_0, %c0_1] : memref<1x256x4xbf16, #tpu.memory_space<vmem>>, vector<1x256x4xbf16>
    %1 = vector.shape_cast %0 : vector<1x256x4xbf16> to vector<256x4xbf16>
    %c0_2 = arith.constant 0 : index
    %c0_3 = arith.constant 0 : index
    %c0_4 = arith.constant 0 : index
    %2 = vector.load %arg3[%c0_2, %c0_3, %c0_4] : memref<1x4x128xbf16, #tpu.memory_space<vmem>>, vector<1x4x128xbf16>
    %3 = vector.shape_cast %2 : vector<1x4x128xbf16> to vector<4x128xbf16>
    %cst = arith.constant dense<0.000000e+00> : vector<256x128xf32>
    %4 = tpu.matmul %1, %3, %cst {dimension_numbers = #tpu.dot_dimension_numbers<[1], [0], [0], [1], [0, 0, 1, 1], [], []>} : vector<256x4xbf16>, vector<4x128xbf16>, vector<256x128xf32> -> vector<256x128xf32>
    %c0_5 = arith.constant 0 : index
    %c0_6 = arith.constant 0 : index
    %c0_7 = arith.constant 0 : index
    %5 = vector.load %arg4[%c0_5, %c0_6, %c0_7] : memref<1x1x128xf32, #tpu.memory_space<vmem>>, vector<1x1x128xf32>
    %6 = vector.shape_cast %5 : vector<1x1x128xf32> to vector<1x128xf32>
    %c0_8 = arith.constant 0 : index
    %c0_9 = arith.constant 0 : index
    %c0_10 = arith.constant 0 : index
    %7 = vector.load %arg5[%c0_8, %c0_9, %c0_10] : memref<1x1x128xf32, #tpu.memory_space<vmem>>, vector<1x1x128xf32>
    %8 = vector.shape_cast %7 : vector<1x1x128xf32> to vector<1x128xf32>
    %9 = vector.broadcast %6 : vector<1x128xf32> to vector<256x128xf32>
    %10 = arith.addf %4, %9 : vector<256x128xf32>
    %cst_11 = arith.constant 0.000000e+00 : f32
    %11 = vector.broadcast %cst_11 : f32 to vector<256x128xf32>
    %12 = arith.cmpf ogt, %10, %11 : vector<256x128xf32>
    %13 = vector.broadcast %8 : vector<1x128xf32> to vector<256x128xf32>
    %14 = arith.mulf %10, %13 : vector<256x128xf32>
    %15 = arith.select %12, %10, %14 : vector<256x128xi1>, vector<256x128xf32>
    %16 = arith.truncf %15 : vector<256x128xf32> to vector<256x128xbf16>
    %c0_12 = arith.constant 0 : index
    %c0_13 = arith.constant 0 : index
    %c0_14 = arith.constant 0 : index
    %17 = vector.load %arg6[%c0_12, %c0_13, %c0_14] : memref<1x256x128xbf16, #tpu.memory_space<vmem>>, vector<1x256x128xbf16>
    %18 = vector.shape_cast %17 : vector<1x256x128xbf16> to vector<256x128xbf16>
    %19 = vector.shape_cast %16 : vector<256x128xbf16> to vector<1x256x128xbf16>
    tpu.vector_store %arg6[%c0_12, %c0_13, %c0_14], %19 {strides = array<i32>} : memref<1x256x128xbf16, #tpu.memory_space<vmem>>, vector<1x256x128xbf16>,
    return
  }
  func.func @transform_0(%arg0: i32, %arg1: i32) -> (i32, i32, i32) {
    %c0_i32 = arith.constant 0 : i32
    %c0_i32_0 = arith.constant 0 : i32
    return %arg0, %arg1, %c0_i32 : i32, i32, i32
  }
  func.func @transform_1(%arg0: i32, %arg1: i32) -> (i32, i32, i32) {
    %c0_i32 = arith.constant 0 : i32
    %c0_i32_0 = arith.constant 0 : i32
    %c0_i32_1 = arith.constant 0 : i32
    return %arg0, %c0_i32, %c0_i32_0 : i32, i32, i32
  }
  func.func @transform_2(%arg0: i32, %arg1: i32) -> (i32, i32, i32) {
    %c0_i32 = arith.constant 0 : i32
    %c0_i32_0 = arith.constant 0 : i32
    %c0_i32_1 = arith.constant 0 : i32
    return %arg0, %c0_i32, %c0_i32_0 : i32, i32, i32
  }
  func.func @transform_3(%arg0: i32, %arg1: i32) -> (i32, i32, i32) {
    %c0_i32 = arith.constant 0 : i32
    %c0_i32_0 = arith.constant 0 : i32
    %c0_i32_1 = arith.constant 0 : i32
    return %arg0, %c0_i32, %c0_i32_0 : i32, i32, i32
  }
  func.func @transform_4(%arg0: i32, %arg1: i32) -> (i32, i32, i32) {
    %c0_i32 = arith.constant 0 : i32
    %c0_i32_0 = arith.constant 0 : i32
    return %arg0, %arg1, %c0_i32 : i32, i32, i32
  }
}

</mosaic_0001>

<bundles_post_ra>
// kernel: conv_block_forward.1
= control target key start
LH: loop header
LB: loop body
LE: loop exit
PB: predicated region body
PF: predicated region fallthrough
CT: control target
= control target key end

     0   :  { %s1357_s15 = smov 0   ;;  %s1359_s16 = smov 0   ;;  %s1529_s0 = inlined_call_operand.vmem [shape: bf16[1,512,4], index: 0, kind: input, shape index: {}]   ;;  %s1530_s1 = inlined_call_operand.vmem [shape: bf16[1,4,128], index: 1, kind: input, shape index: {}]   ;;  %s1531_s2 = inlined_call_operand.vmem [shape: f32[1,1,128], index: 2, kind: input, shape index: {}]   ;;  %s1532_s3 = inlined_call_operand.vmem [shape: f32[1,1,128], index: 3, kind: input, shape index: {}]   ;;  %s1533_s4 = inlined_call_operand.vmem [shape: bf16[1,512,128], index: 4, kind: output, shape index: {}]  }
   0x1   :  { %s1361_s17 = smov 0  }
   0x2 LB: > { %s23_s18 = sadd.s32 1, %s1326_s16  ;;  %p1013_p0 = scmp.ge.s32.totalorder %s1330_s17, 1  ;;  %s1330_s17 = sphi %s1361_s17, %s14_s17   ;;  %s1326_s16 = sphi %s1359_s16, %s1535_s16   ;;  %s1322_s15 = sphi %s1357_s15, %s1534_s15  }
   0x3   : > { %p24_p1 = scmp.ge.s32.totalorder %s23_s18, 2  ;;  %p208_p2 = scmp.lt.s32.totalorder %s1330_s17, 3 }
   0x5   : > { %s1537_s18 = smov (%p24_p1, %s23_s18), 0  ;;  %p209_p3 = pnand %p1013_p0, %p208_p2 }
   0x6   : > { %v315_v0 = vld [vmem:[%s1530_s1] sm:$0x3] (!%p209_p3)  ;;  %vm453_vm0 = vcmask (!%p209_p3), 1041408   ;;  %s1014_s21 = sshll.u32 (!%p209_p3), %s1322_s15, 5  ;;  %vm404_vm1 = vcmask (!%p209_p3), 31744  }
   0x7   : > { %212 = sbr.rel (%p209_p3) target bundleno = 274 (0x112), region = 36  ;;  %1266 = vmatprep.subr.msk.bf16.mxu0 (!%p209_p3), %vm453_vm0, %v315_v0  ;;  %1267 = vmatprep.subr.msk.bf16.mxu1 (!%p209_p3), %vm453_vm0, %v315_v0  ;;  %v455_v1 = vsel (!%p209_p3), %vm453_vm0, %v315_v0, 0  ;;  %p255_p4 = scmp.lt.s32.totalorder (!%p209_p3), %s1014_s21, 63  ;;  %v1423_v18 = vld [vmem:[%s1531_s2] ss:$0 sm:$0xff] (!%p209_p3) }
   0x8   : > { %1231 = vmatpush3.bf16.msra.mxu0 (!%p209_p3), %v455_v1  ;;  %1265 = vmatpush3.bf16.msra.mxu1 (!%p209_p3), %v455_v1  ;;  %v1428_v19 = vld [vmem:[%s1532_s3] ss:$0 sm:$0xff] (!%p209_p3) }
   0xe   : > { %s1539_s21 = smov (!%p255_p4, %s1014_s21), 63 }
   0xf   : > { %s1015_s22 = sshll.u32 %s1539_s21, 2 }
  0x10   : > { %s1386_s25 = scalar_lea.vmem %s1529_s0, %s1015_s22  ;;  %s1448_s6 = scalar_lea.vmem %s1533_s4, %s1015_s22 }
  0x11   : > { %v1292_v2 = vld [vmem:[%s1386_s25] sm:$0xff]   ;;  %v1294_v4 = vld [vmem:[%s1386_s25 + $0x8] sm:$0xff]   ;;  %v1296_v6 = vld [vmem:[%s1386_s25 + $0x10] sm:$0xff]  }
  0x12   : > { %v1293_v3 = vld [vmem:[%s1386_s25 + $0x40] sm:$0xff]   ;;  %1232 = vmatprep.mubr.msk.bf16.mxu0 %vm404_vm1, %v1292_v2  ;;  %v1295_v5 = vld [vmem:[%s1386_s25 + $0x48] sm:$0xff]   ;;  %v1297_v7 = vld [vmem:[%s1386_s25 + $0x50] sm:$0xff]  }
  0x13   : > { %1248 = vmatprep.mubr.msk.bf16.mxu1 %vm404_vm1, %v1293_v3  ;;  %1233 = vmatmul.mubr.msk.bf16.vlgmr.msra.gmra.mrb[0].mxu0 %vm404_vm1, %v1294_v4  ;;  %v1298_v8 = vld [vmem:[%s1386_s25 + $0x18] sm:$0xff]   ;;  %v1300_v10 = vld [vmem:[%s1386_s25 + $0x20] sm:$0xff]   ;;  %v1302_v12 = vld [vmem:[%s1386_s25 + $0x28] sm:$0xff]  }
  0x14   : > { %1249 = vmatmul.mubr.msk.bf16.vlgmr.msra.gmra.mrb[0].mxu1 %vm404_vm1, %v1295_v5  ;;  %1236 = vmatprep.mubr.msk.bf16.mxu0 %vm404_vm1, %v1296_v6  ;;  %v1299_v9 = vld [vmem:[%s1386_s25 + $0x58] sm:$0xff]   ;;  %v1301_v11 = vld [vmem:[%s1386_s25 + $0x60] sm:$0xff]   ;;  %v1303_v13 = vld [vmem:[%s1386_s25 + $0x68] sm:$0xff]  }
  0x15   : > { %1252 = vmatprep.mubr.msk.bf16.mxu1 %vm404_vm1, %v1297_v7  ;;  %v1304_v14 = vld [vmem:[%s1386_s25 + $0x30] sm:$0xff]   ;;  %v1306_v16 = vld [vmem:[%s1386_s25 + $0x38] sm:$0xff]  }
  0x16   : > { %v1305_v15 = vld [vmem:[%s1386_s25 + $0x70] sm:$0xff]   ;;  %v1307_v17 = vld [vmem:[%s1386_s25 + $0x78] sm:$0xff]  }
  0x1b   : > { %1237 = vmatmul.mubr.msk.bf16.gmra.mrb[4].mxu0 %vm404_vm1, %v1298_v8 }
  0x1c   : > { %1253 = vmatmul.mubr.msk.bf16.gmra.mrb[4].mxu1 %vm404_vm1, %v1299_v9  ;;  %1240 = vmatprep.mubr.msk.bf16.mxu0 %vm404_vm1, %v1300_v10 }
  0x1d   : > { %1256 = vmatprep.mubr.msk.bf16.mxu1 %vm404_vm1, %v1301_v11 }
  0x23   : > { %1241 = vmatmul.mubr.msk.bf16.gmra.mrb[8].mxu0 %vm404_vm1, %v1302_v12 }
  0x24   : > { %1257 = vmatmul.mubr.msk.bf16.gmra.mrb[8].mxu1 %vm404_vm1, %v1303_v13  ;;  %1244 = vmatprep.mubr.msk.bf16.mxu0 %vm404_vm1, %v1304_v14 }
  0x25   : > { %1260 = vmatprep.mubr.msk.bf16.mxu1 %vm404_vm1, %v1305_v15 }
  0x2b   : > { %1245 = vmatmul.mubr.msk.bf16.gmra.mrb[12].mxu0 %vm404_vm1, %v1306_v16 }
  0x2c   : > { %1261 = vmatmul.mubr.msk.bf16.gmra.mrb[12].mxu1 %vm404_vm1, %v1307_v17 }
  0xe6   : > { %v1234_v20 = vpop.f32.mrb[0].mxu0 }
  0xe7   : > { %v500_v21 = vadd.f32 %v1234_v20, %v1423_v18  ;;  %v1250_v22 = vpop.f32.mrb[0].mxu1  ;;  %v491_v23 = vpop.f32.mrb[1].mxu0 }
  0xe8   : > { %v564_v24 = vadd.f32 %v1250_v22, %v1423_v18  ;;  %v492_v25 = vadd.f32 %v1423_v18, %v491_v23  ;;  %v555_v26 = vpop.f32.mrb[1].mxu1  ;;  %v1235_v27 = vpop.f32.mrb[2].mxu0 }
  0xe9   : > { %vm620_vm2 = vcmp.gt.f32.partialorder %v500_v21, 0.0  ;;  %v658_v28 = vmul.f32 %v1428_v19, %v500_v21  ;;  %v556_v29 = vadd.f32 %v1423_v18, %v555_v26  ;;  %v503_v30 = vadd.f32 %v1235_v27, %v1423_v18  ;;  %v1251_v31 = vpop.f32.mrb[2].mxu1  ;;  %v494_v32 = vpop.f32.mrb[3].mxu0 }
  0xea   : > { %vm636_vm3 = vcmp.gt.f32.partialorder %v564_v24, 0.0  ;;  %v674_v33 = vmul.f32 %v1428_v19, %v564_v24  ;;  %vm618_vm4 = vcmp.gt.f32.partialorder %v492_v25, 0.0  ;;  %v656_v34 = vmul.f32 %v1428_v19, %v492_v25  ;;  %v558_v35 = vpop.f32.mrb[3].mxu1 }
  0xeb   : > { %vm634_vm5 = vcmp.gt.f32.partialorder %v556_v29, 0.0  ;;  %v672_v36 = vmul.f32 %v1428_v19, %v556_v29  ;;  %vm621_vm6 = vcmp.gt.f32.partialorder %v503_v30, 0.0  ;;  %v690_v37 = vsel %vm620_vm2, %v500_v21, %v658_v28 }
  0xec   : > { %v659_v38 = vmul.f32 %v1428_v19, %v503_v30  ;;  %v567_v39 = vadd.f32 %v1251_v31, %v1423_v18  ;;  %v706_v40 = vsel %vm636_vm3, %v564_v24, %v674_v33  ;;  %v688_v41 = vsel %vm618_vm4, %v492_v25, %v656_v34 }
  0xed   : > { %v495_v42 = vadd.f32 %v1423_v18, %v494_v32  ;;  %v559_v43 = vadd.f32 %v1423_v18, %v558_v35  ;;  %v704_v44 = vsel %vm634_vm5, %v556_v29, %v672_v36 }
  0xee   : > { %v691_v45 = vsel %vm621_vm6, %v503_v30, %v659_v38  ;;  %vm637_vm7 = vcmp.gt.f32.partialorder %v567_v39, 0.0  ;;  %v675_v46 = vmul.f32 %v1428_v19, %v567_v39  ;;  %v1238_v47 = vpop.f32.mrb[4].mxu0 }
  0xef   : > { %v1126_v48 = vpack.c.bf16 %v691_v45, %v690_v37  ;;  %vm619_vm8 = vcmp.gt.f32.partialorder %v495_v42, 0.0  ;;  %v657_v49 = vmul.f32 %v1428_v19, %v495_v42  ;;  %vm635_vm9 = vcmp.gt.f32.partialorder %v559_v43, 0.0  ;;  %v1254_v50 = vpop.f32.mrb[4].mxu1  ;;  %v507_v51 = vpop.f32.mrb[5].mxu0 }
  0xf0   : > { %v707_v52 = vsel %vm637_vm7, %v567_v39, %v675_v46  ;;  %v673_v53 = vmul.f32 %v1428_v19, %v559_v43  ;;  %v516_v54 = vadd.f32 %v1238_v47, %v1423_v18  ;;  %v580_v55 = vadd.f32 %v1254_v50, %v1423_v18  ;;  %v571_v56 = vpop.f32.mrb[5].mxu1  ;;  %v1239_v57 = vpop.f32.mrb[6].mxu0 }
  0xf1   : > { %1198 = vst [vmem:[%s1448_s6 + $0x8] sm:$0xff] %v1126_v48   ;;  %v1166_v58 = vpack.c.bf16 %v707_v52, %v706_v40  ;;  %v689_v59 = vsel %vm619_vm8, %v495_v42, %v657_v49  ;;  %v508_v60 = vadd.f32 %v1423_v18, %v507_v51  ;;  %v572_v61 = vadd.f32 %v1423_v18, %v571_v56  ;;  %v1255_v62 = vpop.f32.mrb[6].mxu1  ;;  %v510_v63 = vpop.f32.mrb[7].mxu0 }
  0xf2   : > { %v1121_v0 = vpack.c.bf16 %v689_v59, %v688_v41  ;;  %v705_v1 = vsel %vm635_vm9, %v559_v43, %v673_v53  ;;  %vm624_vm10 = vcmp.gt.f32.partialorder %v516_v54, 0.0  ;;  %v662_v2 = vmul.f32 %v1428_v19, %v516_v54  ;;  %v574_v3 = vpop.f32.mrb[7].mxu1 }
  0xf3   : > { %1206 = vst [vmem:[%s1448_s6 + $0x48] sm:$0xff] %v1166_v58   ;;  %v1161_v4 = vpack.c.bf16 %v705_v1, %v704_v44  ;;  %vm640_vm11 = vcmp.gt.f32.partialorder %v580_v55, 0.0  ;;  %v678_v5 = vmul.f32 %v1428_v19, %v580_v55  ;;  %vm622_vm12 = vcmp.gt.f32.partialorder %v508_v60, 0.0 }
  0xf4   : > { %1122 = vst [vmem:[%s1448_s6] sm:$0xff] %v1121_v0   ;;  %v660_v6 = vmul.f32 %v1428_v19, %v508_v60  ;;  %vm638_vm13 = vcmp.gt.f32.partialorder %v572_v61, 0.0  ;;  %v676_v7 = vmul.f32 %v1428_v19, %v572_v61  ;;  %v694_v8 = vsel %vm624_vm10, %v516_v54, %v662_v2 }
  0xf5   : > { %1205 = vst [vmem:[%s1448_s6 + $0x40] sm:$0xff] %v1161_v4   ;;  %v519_v9 = vadd.f32 %v1239_v57, %v1423_v18  ;;  %v583_v10 = vadd.f32 %v1255_v62, %v1423_v18  ;;  %v511_v11 = vadd.f32 %v1423_v18, %v510_v63  ;;  %v710_v12 = vsel %vm640_vm11, %v580_v55, %v678_v5 }
  0xf6   : > { %v692_v13 = vsel %vm622_vm12, %v508_v60, %v660_v6  ;;  %v708_v14 = vsel %vm638_vm13, %v572_v61, %v676_v7  ;;  %v575_v15 = vadd.f32 %v1423_v18, %v574_v3  ;;  %v1242_v16 = vpop.f32.mrb[8].mxu0 }
  0xf7   : > { %vm625_vm14 = vcmp.gt.f32.partialorder %v519_v9, 0.0  ;;  %v663_v17 = vmul.f32 %v1428_v19, %v519_v9  ;;  %vm641_vm15 = vcmp.gt.f32.partialorder %v583_v10, 0.0  ;;  %v679_v20 = vmul.f32 %v1428_v19, %v583_v10  ;;  %v1258_v21 = vpop.f32.mrb[8].mxu1  ;;  %v523_v22 = vpop.f32.mrb[9].mxu0 }
  0xf8   : > { %vm623_vm0 = vcmp.gt.f32.partialorder %v511_v11, 0.0  ;;  %v661_v23 = vmul.f32 %v1428_v19, %v511_v11  ;;  %vm639_vm1 = vcmp.gt.f32.partialorder %v575_v15, 0.0  ;;  %v677_v24 = vmul.f32 %v1428_v19, %v575_v15  ;;  %v587_v25 = vpop.f32.mrb[9].mxu1  ;;  %v1243_v26 = vpop.f32.mrb[10].mxu0 }
  0xf9   : > { %v695_v27 = vsel %vm625_vm14, %v519_v9, %v663_v17  ;;  %v711_v28 = vsel %vm641_vm15, %v583_v10, %v679_v20  ;;  %v532_v29 = vadd.f32 %v1242_v16, %v1423_v18  ;;  %v596_v30 = vadd.f32 %v1258_v21, %v1423_v18  ;;  %v1259_v31 = vpop.f32.mrb[10].mxu1  ;;  %v526_v32 = vpop.f32.mrb[11].mxu0 }
  0xfa   : > { %v1136_v33 = vpack.c.bf16 %v695_v27, %v694_v8  ;;  %v1176_v34 = vpack.c.bf16 %v711_v28, %v710_v12  ;;  %v693_v35 = vsel %vm623_vm0, %v511_v11, %v661_v23  ;;  %v709_v36 = vsel %vm639_vm1, %v575_v15, %v677_v24  ;;  %v590_v37 = vpop.f32.mrb[11].mxu1 }
  0xfb   : > { %v1131_v38 = vpack.c.bf16 %v693_v35, %v692_v13  ;;  %v1171_v39 = vpack.c.bf16 %v709_v36, %v708_v14  ;;  %vm628_vm2 = vcmp.gt.f32.partialorder %v532_v29, 0.0  ;;  %v666_v40 = vmul.f32 %v1428_v19, %v532_v29 }
  0xfc   : > { %1200 = vst [vmem:[%s1448_s6 + $0x18] sm:$0xff] %v1136_v33   ;;  %1208 = vst [vmem:[%s1448_s6 + $0x58] sm:$0xff] %v1176_v34   ;;  %vm644_vm3 = vcmp.gt.f32.partialorder %v596_v30, 0.0  ;;  %v682_v41 = vmul.f32 %v1428_v19, %v596_v30  ;;  %v524_v42 = vadd.f32 %v1423_v18, %v523_v22  ;;  %v588_v43 = vadd.f32 %v1423_v18, %v587_v25 }
  0xfd   : > { %1199 = vst [vmem:[%s1448_s6 + $0x10] sm:$0xff] %v1131_v38   ;;  %1207 = vst [vmem:[%s1448_s6 + $0x50] sm:$0xff] %v1171_v39   ;;  %v535_v44 = vadd.f32 %v1243_v26, %v1423_v18  ;;  %v599_v45 = vadd.f32 %v1259_v31, %v1423_v18  ;;  %v527_v46 = vadd.f32 %v1423_v18, %v526_v32 }
  0xfe   : > { %v698_v47 = vsel %vm628_vm2, %v532_v29, %v666_v40  ;;  %v714_v48 = vsel %vm644_vm3, %v596_v30, %v682_v41  ;;  %vm626_vm4 = vcmp.gt.f32.partialorder %v524_v42, 0.0  ;;  %v664_v49 = vmul.f32 %v1428_v19, %v524_v42  ;;  %v1246_v50 = vpop.f32.mrb[12].mxu0 }
  0xff   : > { %vm642_vm5 = vcmp.gt.f32.partialorder %v588_v43, 0.0  ;;  %vm629_vm6 = vcmp.gt.f32.partialorder %v535_v44, 0.0  ;;  %v667_v51 = vmul.f32 %v1428_v19, %v535_v44  ;;  %vm645_vm7 = vcmp.gt.f32.partialorder %v599_v45, 0.0  ;;  %v1262_v52 = vpop.f32.mrb[12].mxu1  ;;  %v539_v53 = vpop.f32.mrb[13].mxu0 }
 0x100   : > { %v680_v54 = vmul.f32 %v1428_v19, %v588_v43  ;;  %v683_v55 = vmul.f32 %v1428_v19, %v599_v45  ;;  %vm627_vm8 = vcmp.gt.f32.partialorder %v527_v46, 0.0  ;;  %v665_v56 = vmul.f32 %v1428_v19, %v527_v46  ;;  %v603_v57 = vpop.f32.mrb[13].mxu1  ;;  %v1247_v58 = vpop.f32.mrb[14].mxu0 }
 0x101   : > { %v696_v59 = vsel %vm626_vm4, %v524_v42, %v664_v49  ;;  %v699_v60 = vsel %vm629_vm6, %v535_v44, %v667_v51  ;;  %v591_v61 = vadd.f32 %v1423_v18, %v590_v37  ;;  %v548_v62 = vadd.f32 %v1246_v50, %v1423_v18  ;;  %v1263_v63 = vpop.f32.mrb[14].mxu1  ;;  %v542_v0 = vpop.f32.mrb[15].mxu0 }
 0x102   : > { %v1146_v1 = vpack.c.bf16 %v699_v60, %v698_v47  ;;  %v715_v2 = vsel %vm645_vm7, %v599_v45, %v683_v55  ;;  %v697_v3 = vsel %vm627_vm8, %v527_v46, %v665_v56  ;;  %v612_v4 = vadd.f32 %v1262_v52, %v1423_v18  ;;  %v606_v5 = vpop.f32.mrb[15].mxu1 }
 0x103   : > { %v1186_v6 = vpack.c.bf16 %v715_v2, %v714_v48  ;;  %v1141_v7 = vpack.c.bf16 %v697_v3, %v696_v59  ;;  %vm643_vm9 = vcmp.gt.f32.partialorder %v591_v61, 0.0  ;;  %v681_v8 = vmul.f32 %v1428_v19, %v591_v61 }
 0x104   : > { %1202 = vst [vmem:[%s1448_s6 + $0x28] sm:$0xff] %v1146_v1   ;;  %vm632_vm10 = vcmp.gt.f32.partialorder %v548_v62, 0.0  ;;  %v670_v9 = vmul.f32 %v1428_v19, %v548_v62  ;;  %vm648_vm11 = vcmp.gt.f32.partialorder %v612_v4, 0.0  ;;  %v686_v10 = vmul.f32 %v1428_v19, %v612_v4 }
 0x105   : > { %v712_v11 = vsel %vm642_vm5, %v588_v43, %v680_v54  ;;  %1210 = vst [vmem:[%s1448_s6 + $0x68] sm:$0xff] %v1186_v6   ;;  %1201 = vst [vmem:[%s1448_s6 + $0x20] sm:$0xff] %v1141_v7   ;;  %v713_v12 = vsel %vm643_vm9, %v591_v61, %v681_v8  ;;  %v540_v13 = vadd.f32 %v1423_v18, %v539_v53 }
 0x106   : > { %v551_v14 = vadd.f32 %v1247_v58, %v1423_v18  ;;  %v1181_v15 = vpack.c.bf16 %v713_v12, %v712_v11  ;;  %v604_v16 = vadd.f32 %v1423_v18, %v603_v57  ;;  %v615_v17 = vadd.f32 %v1263_v63, %v1423_v18 }
 0x107   : > { %v702_v20 = vsel %vm632_vm10, %v548_v62, %v670_v9  ;;  %v718_v21 = vsel %vm648_vm11, %v612_v4, %v686_v10  ;;  %vm630_vm14 = vcmp.gt.f32.partialorder %v540_v13, 0.0  ;;  %v668_v24 = vmul.f32 %v1428_v19, %v540_v13 }
 0x108   : > { %1209 = vst [vmem:[%s1448_s6 + $0x60] sm:$0xff] %v1181_v15   ;;  %vm633_vm12 = vcmp.gt.f32.partialorder %v551_v14, 0.0  ;;  %v671_v22 = vmul.f32 %v1428_v19, %v551_v14  ;;  %vm649_vm13 = vcmp.gt.f32.partialorder %v615_v17, 0.0  ;;  %v687_v23 = vmul.f32 %v1428_v19, %v615_v17 }
 0x109   : > { %v543_v25 = vadd.f32 %v1423_v18, %v542_v0  ;;  %v607_v26 = vadd.f32 %v1423_v18, %v606_v5  ;;  %vm646_vm15 = vcmp.gt.f32.partialorder %v604_v16, 0.0  ;;  %v684_v27 = vmul.f32 %v1428_v19, %v604_v16 }
 0x10a   : > { %v703_v28 = vsel %vm633_vm12, %v551_v14, %v671_v22  ;;  %v719_v29 = vsel %vm649_vm13, %v615_v17, %v687_v23  ;;  %v700_v34 = vsel %vm630_vm14, %v540_v13, %v668_v24 }
 0x10b   : > { %v1156_v30 = vpack.c.bf16 %v703_v28, %v702_v20  ;;  %v1196_v31 = vpack.c.bf16 %v719_v29, %v718_v21  ;;  %vm631_vm0 = vcmp.gt.f32.partialorder %v543_v25, 0.0  ;;  %v669_v32 = vmul.f32 %v1428_v19, %v543_v25 }
 0x10c   : > { %vm647_vm1 = vcmp.gt.f32.partialorder %v607_v26, 0.0  ;;  %v685_v33 = vmul.f32 %v1428_v19, %v607_v26  ;;  %v716_v18 = vsel %vm646_vm15, %v604_v16, %v684_v27 }
 0x10d   : > { %1204 = vst [vmem:[%s1448_s6 + $0x38] sm:$0xff] %v1156_v30   ;;  %1212 = vst [vmem:[%s1448_s6 + $0x78] sm:$0xff] %v1196_v31   ;;  %v701_v35 = vsel %vm631_vm0, %v543_v25, %v669_v32 }
 0x10e   : > { %v1151_v36 = vpack.c.bf16 %v701_v35, %v700_v34  ;;  %v717_v37 = vsel %vm647_vm1, %v607_v26, %v685_v33 }
 0x10f   : > { %v1191_v38 = vpack.c.bf16 %v717_v37, %v716_v18 }
 0x110   : > { %1203 = vst [vmem:[%s1448_s6 + $0x30] sm:$0xff] %v1151_v36  }
 0x111   : > { %1211 = vst [vmem:[%s1448_s6 + $0x70] sm:$0xff] %v1191_v38  }
 0x112 PF: > { %s14_s17 = sadd.s32 1, %s1330_s17   ;;  %s1534_s15 = smov %s1326_s16 }
 0x113   : > { %p11_p5 = scmp.ge.s32.totalorder %s14_s17, 4   ;;  %s1535_s16 = smov %s1537_s18 }
 0x115   :  { %13 = sbr.rel (!%p11_p5) target bundleno = 2 (0x2), region = 75 }

</bundles_post_ra>
